<compile_context>
chip_gen: v7x
topology: tpu7x:2x2x1
jax: 0.10.0
libtpu: 0.0.40
codegen_flags: <defaults>
</compile_context>

<pallas_src>
import functools

import jax
import jax.numpy as jnp
from jax.experimental import pallas as pl
from jax.experimental.pallas import tpu as pltpu


LANE = 128


def concept_mixer_kernel(
    h_ref,      # (TM, hd_p)           hidden-token row tile (lane-padded)
    c_ref,      # (TM, cd_p)           concept-token row tile (lane-padded)
    wcp_ref,    # (cd_p, cd_p)         concept_proj weight (in, out)
    bcp_ref,    # (1, cd_p)            concept_proj bias
    whg_ref,    # (hd_p, 2*cd_p)       fused [hidden_to_concept | gate] weight
    bhg_ref,    # (1, 2*cd_p)          fused [hidden_to_concept | gate] bias
    wfc_ref,    # (cd_p, hd_p)         hidden_from_concept weight
    bfc_ref,    # (1, hd_p)            hidden_from_concept bias
    out_ref,    # (TM, hd_p)
    *,
    concept_dim,          # padded concept dim (128-multiple) => lane-aligned split
    mxu_dtype,            # None: keep operand dtype; jnp.bfloat16: cast for the MXU
):
    h = h_ref[...]
    c = c_ref[...]
    if mxu_dtype is not None:
        h = h.astype(mxu_dtype)
        c = c.astype(mxu_dtype)
        wcp = wcp_ref[...].astype(mxu_dtype)
        whg = whg_ref[...].astype(mxu_dtype)
        wfc = wfc_ref[...].astype(mxu_dtype)
    else:
        wcp = wcp_ref[...]
        whg = whg_ref[...]
        wfc = wfc_ref[...]

    # layer_concept_token = concept_proj(concept_token)
    layer_c = (
        jnp.dot(c, wcp, preferred_element_type=jnp.float32)
        + bcp_ref[...].astype(jnp.float32)
    )

    # One lane-dense MXU pass produces hidden_to_concept(h) and gate(h) together.
    hg = (
        jnp.dot(h, whg, preferred_element_type=jnp.float32)
        + bhg_ref[...].astype(jnp.float32)
    )
    h_up = hg[:, :concept_dim]             # lane-aligned (concept_dim % 128 == 0)
    gate = jnp.tanh(hg[:, concept_dim:])   # EUP tanh in f32

    # Gated mix, back to MXU operand dtype for the final pass.
    mix = (h_up + gate * layer_c).astype(h.dtype)

    # hidden_token_out = hidden_from_concept(mix)
    out = (
        jnp.dot(mix, wfc, preferred_element_type=jnp.float32)
        + bfc_ref[...].astype(jnp.float32)
    )
    out_ref[...] = out.astype(out_ref.dtype)


def _round_up(x, m):
    return ((x + m - 1) // m) * m


def _vmem_budget_bytes():
    """Generation-aware VMEM budget for this kernel's working set."""
    cap = 64 << 20
    try:
        info = pltpu.get_tpu_info()
        cap = int(getattr(info, "vmem_capacity_bytes", cap))
    except Exception:
        pass
    if cap <= (64 << 20):
        # v7x: 64 MiB/TC physical — leave headroom for spills / internal scratch.
        return 48 << 20
    # v5e/v6e: 128 MiB physical — use most of it (weights are single-buffered).
    return int(min(cap - (16 << 20), 110 << 20))


def _pick_tile_rows(M, tile_m, sublane, per_row_bytes, fixed_bytes, budget_bytes):
    # Cap at ceil(M/2) rows so the ("parallel",) grid has >= 2 steps whenever M
    # allows it (v7x shards parallel grid axes across its 2 TensorCores).
    cap_rows = max(sublane, _round_up(pl.cdiv(M, 2), sublane))
    rows = max(sublane, min(_round_up(tile_m, sublane), cap_rows))
    # Shrink until the per-step VMEM estimate fits the generation budget.
    while rows > sublane and fixed_bytes + rows * per_row_bytes > budget_bytes:
        rows = max(sublane, _round_up(rows // 2, sublane))
    return rows


def prepare_params(params, hidden_dim, concept_dim, lane=LANE):
    """One-time parameter packing (do this at parameter-build time, NOT per call):
    fuse hidden_to_concept|gate into one matrix and zero-pad every dim to a lane
    (128) multiple so all MXU passes and output stores are lane-dense.  Zero padding
    is exact: padded input lanes are zero, padded gate lanes are tanh(0)=0, so padded
    lanes never leak into valid outputs."""
    hd_p = _round_up(hidden_dim, lane)
    cd_p = _round_up(concept_dim, lane)

    def pad2(w, rows, cols):
        return jnp.pad(w, ((0, rows - w.shape[0]), (0, cols - w.shape[1])))

    whg = jnp.concatenate(
        [pad2(params["whc"], hd_p, cd_p), pad2(params["wg"], hd_p, cd_p)], axis=1
    )
    bhg = jnp.concatenate(
        [pad2(params["bhc"], 1, cd_p), pad2(params["bg"], 1, cd_p)], axis=1
    )
    return dict(
        wcp=pad2(params["wcp"], cd_p, cd_p),
        bcp=pad2(params["bcp"], 1, cd_p),
        whg=whg,
        bhg=bhg,
        wfc=pad2(params["wfc"], cd_p, hd_p),
        bfc=pad2(params["bfc"], 1, hd_p),
    )


@functools.partial(jax.jit, static_argnames=("tile_m", "mxu_bf16"))
def concept_mixer(hidden_token, concept_token, prepared, tile_m=None, mxu_bf16=False):
    """hidden_token: (B, S, hidden_dim); concept_token: (B, S, concept_dim);
    prepared: output of prepare_params (fused + lane-padded weights)."""
    B, S, hidden_dim = hidden_token.shape
    _, _, concept_dim = concept_token.shape
    M = B * S

    wcp, bcp = prepared["wcp"], prepared["bcp"]
    whg, bhg = prepared["whg"], prepared["bhg"]
    wfc, bfc = prepared["wfc"], prepared["bfc"]
    cd_p = wcp.shape[0]          # padded concept dim (128-multiple)
    hd_p = wfc.shape[1]          # padded hidden dim  (128-multiple)
    assert whg.shape == (hd_p, 2 * cd_p) and bhg.shape == (1, 2 * cd_p)

    h2d = hidden_token.reshape(M, hidden_dim)
    c2d = concept_token.reshape(M, concept_dim)
    # Lane-pad activations only when dims are not already 128-aligned (tiny demo
    # dims); at production dims these are no-ops.
    if hd_p != hidden_dim:
        h2d = jnp.pad(h2d, ((0, 0), (0, hd_p - hidden_dim)))
    if cd_p != concept_dim:
        c2d = jnp.pad(c2d, ((0, 0), (0, cd_p - concept_dim)))

    act_dtype = h2d.dtype
    # bf16-native MXU on v6e/v7x: optionally cast f32 operands to bf16 in-kernel
    # (f32 accumulation kept).  Plain f32 operands take the slower multi-pass path.
    mxu_dtype = jnp.bfloat16 if (mxu_bf16 and act_dtype == jnp.float32) else None

    sublane = 16 if act_dtype == jnp.bfloat16 else 8
    if tile_m is None:
        # Bigger tiles amortize per-step overhead; smaller for f32 bounds the f32
        # intermediate store traffic (v5e has a single vst slot).
        tile_m = 1024 if act_dtype == jnp.bfloat16 else 512

    act_isz = jnp.dtype(act_dtype).itemsize
    w_isz = jnp.dtype(wcp.dtype).itemsize
    weight_elems = (
        cd_p * cd_p + hd_p * 2 * cd_p + cd_p * hd_p + 3 * cd_p + hd_p
    )
    weight_bytes = weight_elems * w_isz                       # single-buffered
    # Per-row VMEM: double-buffered h/c input tiles + output tile, plus the f32
    # intermediates (hg, layer_c, gate, mix, out-f32) Mosaic materializes in VMEM.
    per_row_bytes = (2 * (hd_p + cd_p) + 2 * hd_p) * act_isz + (4 * cd_p + 2 * hd_p) * 4
    budget = _vmem_budget_bytes()
    fixed_bytes = weight_bytes + (4 << 20)                    # + internal scratch slack

    tile_rows = _pick_tile_rows(M, tile_m, sublane, per_row_bytes, fixed_bytes, budget)
    grid = (pl.cdiv(M, tile_rows),)

    def row_map(i):
        return (i, 0)

    def full_map(i):
        return (0, 0)

    # Grid-invariant operands: single-buffer to halve their VMEM residency.
    weight_mode = pl.Buffered(buffer_count=1)

    in_specs = [
        pl.BlockSpec((tile_rows, hd_p), row_map),
        pl.BlockSpec((tile_rows, cd_p), row_map),
        pl.BlockSpec((cd_p, cd_p), full_map, pipeline_mode=weight_mode),
        pl.BlockSpec((1, cd_p), full_map, pipeline_mode=weight_mode),
        pl.BlockSpec((hd_p, 2 * cd_p), full_map, pipeline_mode=weight_mode),
        pl.BlockSpec((1, 2 * cd_p), full_map, pipeline_mode=weight_mode),
        pl.BlockSpec((cd_p, hd_p), full_map, pipeline_mode=weight_mode),
        pl.BlockSpec((1, hd_p), full_map, pipeline_mode=weight_mode),
    ]

    # Advisory cost estimate for XLA scheduling (padded dims = actual work done).
    flops = 2 * M * (cd_p * cd_p + 3 * hd_p * cd_p)
    bytes_accessed = (
        M * (hd_p + cd_p) * act_isz      # activation reads
        + weight_elems * w_isz           # weights / biases
        + M * hd_p * act_isz             # output
    )
    cost = pl.CostEstimate(
        flops=int(flops), transcendentals=int(M * cd_p), bytes_accessed=int(bytes_accessed)
    )

    out2d = pl.pallas_call(
        functools.partial(
            concept_mixer_kernel, concept_dim=cd_p, mxu_dtype=mxu_dtype
        ),
        out_shape=jax.ShapeDtypeStruct((M, hd_p), hidden_token.dtype),
        grid_spec=pltpu.PrefetchScalarGridSpec(
            num_scalar_prefetch=0,
            grid=grid,
            in_specs=in_specs,
            out_specs=pl.BlockSpec((tile_rows, hd_p), row_map),
        ),
        compiler_params=pltpu.CompilerParams(
            dimension_semantics=("parallel",),
            vmem_limit_bytes=int(budget),
        ),
        cost_estimate=cost,
    )(h2d, c2d, wcp, bcp, whg, bhg, wfc, bfc)

    if hd_p != hidden_dim:
        out2d = out2d[:, :hidden_dim]
    return out2d.reshape(B, S, hidden_dim)


def init_params(key, hidden_dim, concept_dim, dtype=jnp.float32):
    """Deterministic init matching nn.Linear fan-in bounds; weights stored (in, out)."""
    ks = jax.random.split(key, 8)

    def linear(kw, kb, fan_in, fan_out):
        bound = 1.0 / jnp.sqrt(fan_in)
        w = jax.random.uniform(kw, (fan_in, fan_out), dtype, -bound, bound)
        b = jax.random.uniform(kb, (1, fan_out), dtype, -bound, bound)
        return w, b

    wcp, bcp = linear(ks[0], ks[1], concept_dim, concept_dim)   # concept_proj
    whc, bhc = linear(ks[2], ks[3], hidden_dim, concept_dim)    # hidden_to_concept
    wg, bg = linear(ks[4], ks[5], hidden_dim, concept_dim)      # gate
    wfc, bfc = linear(ks[6], ks[7], concept_dim, hidden_dim)    # hidden_from_concept
    return dict(wcp=wcp, bcp=bcp, whc=whc, bhc=bhc,
                wg=wg, bg=bg, wfc=wfc, bfc=bfc)


def concept_mixer_ref(hidden_token, concept_token, params):
    """Pure-JAX reference of the PyTorch forward (f32)."""
    h = hidden_token.astype(jnp.float32)
    c = concept_token.astype(jnp.float32)
    p = {k: v.astype(jnp.float32) for k, v in params.items()}
    layer_c = c @ p["wcp"] + p["bcp"][0]
    h_up = h @ p["whc"] + p["bhc"][0]
    g = jnp.tanh(h @ p["wg"] + p["bg"][0])
    mix = h_up + g * layer_c
    return mix @ p["wfc"] + p["bfc"][0]


if __name__ == "__main__":
    batch, seq, hidden_dim, concept_dim = 2, 8, 32, 64

    key = jax.random.PRNGKey(0)
    k_h, k_c, k_p = jax.random.split(key, 3)

    hidden_token = jax.random.normal(k_h, (batch, seq, hidden_dim), jnp.float32)
    concept_token = jax.random.normal(k_c, (batch, seq, concept_dim), jnp.float32)
    params = init_params(k_p, hidden_dim, concept_dim)
    prepared = prepare_params(params, hidden_dim, concept_dim)   # one-time fusion+padding

    ref = concept_mixer_ref(hidden_token, concept_token, params)

    # f32 path: f32 MXU operands, f32 accumulation -> tight tolerance.
    out = jax.block_until_ready(concept_mixer(hidden_token, concept_token, prepared))
    assert out.shape == (batch, seq, hidden_dim)
    assert jnp.allclose(out, ref, atol=2e-4, rtol=2e-4), \
        "Pallas f32 output mismatch vs reference"

    # f32 inputs with bf16 MXU operands (f32 accumulate): fast path on v6e/v7x.
    out_fast = jax.block_until_ready(
        concept_mixer(hidden_token, concept_token, prepared, mxu_bf16=True))
    assert out_fast.shape == (batch, seq, hidden_dim)
    assert jnp.allclose(out_fast, ref, atol=1e-1, rtol=5e-2), \
        "Pallas f32(bf16-MXU) output mismatch vs reference"

    # bf16 end-to-end path.
    h_bf = hidden_token.astype(jnp.bfloat16)
    c_bf = concept_token.astype(jnp.bfloat16)
    p_bf = {k: v.astype(jnp.bfloat16) for k, v in params.items()}
    prepared_bf = prepare_params(p_bf, hidden_dim, concept_dim)
    out_bf = jax.block_until_ready(concept_mixer(h_bf, c_bf, prepared_bf))
    ref_bf = concept_mixer_ref(h_bf, c_bf, p_bf)
    assert out_bf.shape == (batch, seq, hidden_dim)
    assert jnp.allclose(out_bf.astype(jnp.float32), ref_bf, atol=2e-1, rtol=5e-2), \
        "Pallas bf16 output mismatch vs reference"

    print("KERNEL_OK")
</pallas_src>

<mosaic_0001>
module attributes {stable_mosaic.version = 11 : i64} {
  func.func @concept_mixer_kernel(%arg0: i32, %arg1: memref<8x128xf32, #tpu.memory_space<vmem>>, %arg2: memref<8x128xf32, #tpu.memory_space<vmem>>, %arg3: memref<128x128xf32, #tpu.memory_space<vmem>>, %arg4: memref<1x128xf32, #tpu.memory_space<vmem>>, %arg5: memref<128x256xf32, #tpu.memory_space<vmem>>, %arg6: memref<1x256xf32, #tpu.memory_space<vmem>>, %arg7: memref<128x128xf32, #tpu.memory_space<vmem>>, %arg8: memref<1x128xf32, #tpu.memory_space<vmem>>, %arg9: memref<8x128xf32, #tpu.memory_space<vmem>>) attributes {dimension_semantics = [#tpu.dimension_semantics<parallel>], iteration_bounds = array<i64: 2>, scalar_prefetch = 0 : i64, scratch_operands = 0 : i64, tpu.core_type = #tpu.core_type<tc>, window_params = [{transform_indices = @transform_0, window_bounds = array<i64: 8, 128>}, {transform_indices = @transform_1, window_bounds = array<i64: 8, 128>}, {pipeline_mode = #tpu.pipeline_mode<synchronous>, transform_indices = @transform_2, window_bounds = array<i64: 128, 128>}, {pipeline_mode = #tpu.pipeline_mode<synchronous>, transform_indices = @transform_3, window_bounds = array<i64: 1, 128>}, {pipeline_mode = #tpu.pipeline_mode<synchronous>, transform_indices = @transform_4, window_bounds = array<i64: 128, 256>}, {pipeline_mode = #tpu.pipeline_mode<synchronous>, transform_indices = @transform_5, window_bounds = array<i64: 1, 256>}, {pipeline_mode = #tpu.pipeline_mode<synchronous>, transform_indices = @transform_6, window_bounds = array<i64: 128, 128>}, {pipeline_mode = #tpu.pipeline_mode<synchronous>, transform_indices = @transform_7, window_bounds = array<i64: 1, 128>}, {transform_indices = @transform_8, window_bounds = array<i64: 8, 128>}]} {
    %c0 = arith.constant 0 : index
    %c0_0 = arith.constant 0 : index
    %0 = vector.load %arg1[%c0, %c0_0] : memref<8x128xf32, #tpu.memory_space<vmem>>, vector<8x128xf32>
    %c0_1 = arith.constant 0 : index
    %c0_2 = arith.constant 0 : index
    %1 = vector.load %arg2[%c0_1, %c0_2] : memref<8x128xf32, #tpu.memory_space<vmem>>, vector<8x128xf32>
    %c0_3 = arith.constant 0 : index
    %c0_4 = arith.constant 0 : index
    %2 = vector.load %arg3[%c0_3, %c0_4] : memref<128x128xf32, #tpu.memory_space<vmem>>, vector<128x128xf32>
    %c0_5 = arith.constant 0 : index
    %c0_6 = arith.constant 0 : index
    %3 = vector.load %arg5[%c0_5, %c0_6] : memref<128x256xf32, #tpu.memory_space<vmem>>, vector<128x256xf32>
    %c0_7 = arith.constant 0 : index
    %c0_8 = arith.constant 0 : index
    %4 = vector.load %arg7[%c0_7, %c0_8] : memref<128x128xf32, #tpu.memory_space<vmem>>, vector<128x128xf32>
    %cst = arith.constant dense<0.000000e+00> : vector<8x128xf32>
    %5 = tpu.matmul %1, %2, %cst {dimension_numbers = #tpu.dot_dimension_numbers<[1], [0], [0], [1], [0, 0, 1, 1], [], []>} : vector<8x128xf32>, vector<128x128xf32>, vector<8x128xf32> -> vector<8x128xf32>
    %c0_9 = arith.constant 0 : index
    %c0_10 = arith.constant 0 : index
    %6 = vector.load %arg4[%c0_9, %c0_10] : memref<1x128xf32, #tpu.memory_space<vmem>>, vector<1x128xf32>
    %7 = vector.broadcast %6 : vector<1x128xf32> to vector<8x128xf32>
    %8 = arith.addf %5, %7 : vector<8x128xf32>
    %cst_11 = arith.constant dense<0.000000e+00> : vector<8x256xf32>
    %9 = tpu.matmul %0, %3, %cst_11 {dimension_numbers = #tpu.dot_dimension_numbers<[1], [0], [0], [1], [0, 0, 1, 1], [], []>} : vector<8x128xf32>, vector<128x256xf32>, vector<8x256xf32> -> vector<8x256xf32>
    %c0_12 = arith.constant 0 : index
    %c0_13 = arith.constant 0 : index
    %10 = vector.load %arg6[%c0_12, %c0_13] : memref<1x256xf32, #tpu.memory_space<vmem>>, vector<1x256xf32>
    %11 = vector.broadcast %10 : vector<1x256xf32> to vector<8x256xf32>
    %12 = arith.addf %9, %11 : vector<8x256xf32>
    %13 = vector.extract_strided_slice %12 {offsets = [0, 0], sizes = [8, 128], strides = [1, 1]} : vector<8x256xf32> to vector<8x128xf32>
    %14 = vector.extract_strided_slice %12 {offsets = [0, 128], sizes = [8, 128], strides = [1, 1]} : vector<8x256xf32> to vector<8x128xf32>
    %15 = math.tanh %14 : vector<8x128xf32>
    %16 = arith.mulf %15, %8 : vector<8x128xf32>
    %17 = arith.addf %13, %16 : vector<8x128xf32>
    %cst_14 = arith.constant dense<0.000000e+00> : vector<8x128xf32>
    %18 = tpu.matmul %17, %4, %cst_14 {dimension_numbers = #tpu.dot_dimension_numbers<[1], [0], [0], [1], [0, 0, 1, 1], [], []>} : vector<8x128xf32>, vector<128x128xf32>, vector<8x128xf32> -> vector<8x128xf32>
    %c0_15 = arith.constant 0 : index
    %c0_16 = arith.constant 0 : index
    %19 = vector.load %arg8[%c0_15, %c0_16] : memref<1x128xf32, #tpu.memory_space<vmem>>, vector<1x128xf32>
    %20 = vector.broadcast %19 : vector<1x128xf32> to vector<8x128xf32>
    %21 = arith.addf %18, %20 : vector<8x128xf32>
    %c0_17 = arith.constant 0 : index
    %c0_18 = arith.constant 0 : index
    %22 = vector.load %arg9[%c0_17, %c0_18] : memref<8x128xf32, #tpu.memory_space<vmem>>, vector<8x128xf32>
    tpu.vector_store %arg9[%c0_17, %c0_18], %21 {strides = array<i32>} : memref<8x128xf32, #tpu.memory_space<vmem>>, vector<8x128xf32>,
    return
  }
  func.func @transform_0(%arg0: i32) -> (i32, i32) {
    %c0_i32 = arith.constant 0 : i32
    %c0_i32_0 = arith.constant 0 : i32
    return %arg0, %c0_i32 : i32, i32
  }
  func.func @transform_1(%arg0: i32) -> (i32, i32) {
    %c0_i32 = arith.constant 0 : i32
    %c0_i32_0 = arith.constant 0 : i32
    return %arg0, %c0_i32 : i32, i32
  }
  func.func @transform_2(%arg0: i32) -> (i32, i32) {
    %c0_i32 = arith.constant 0 : i32
    %c0_i32_0 = arith.constant 0 : i32
    %c0_i32_1 = arith.constant 0 : i32
    return %c0_i32, %c0_i32_0 : i32, i32
  }
  func.func @transform_3(%arg0: i32) -> (i32, i32) {
    %c0_i32 = arith.constant 0 : i32
    %c0_i32_0 = arith.constant 0 : i32
    %c0_i32_1 = arith.constant 0 : i32
    return %c0_i32, %c0_i32_0 : i32, i32
  }
  func.func @transform_4(%arg0: i32) -> (i32, i32) {
    %c0_i32 = arith.constant 0 : i32
    %c0_i32_0 = arith.constant 0 : i32
    %c0_i32_1 = arith.constant 0 : i32
    return %c0_i32, %c0_i32_0 : i32, i32
  }
  func.func @transform_5(%arg0: i32) -> (i32, i32) {
    %c0_i32 = arith.constant 0 : i32
    %c0_i32_0 = arith.constant 0 : i32
    %c0_i32_1 = arith.constant 0 : i32
    return %c0_i32, %c0_i32_0 : i32, i32
  }
  func.func @transform_6(%arg0: i32) -> (i32, i32) {
    %c0_i32 = arith.constant 0 : i32
    %c0_i32_0 = arith.constant 0 : i32
    %c0_i32_1 = arith.constant 0 : i32
    return %c0_i32, %c0_i32_0 : i32, i32
  }
  func.func @transform_7(%arg0: i32) -> (i32, i32) {
    %c0_i32 = arith.constant 0 : i32
    %c0_i32_0 = arith.constant 0 : i32
    %c0_i32_1 = arith.constant 0 : i32
    return %c0_i32, %c0_i32_0 : i32, i32
  }
  func.func @transform_8(%arg0: i32) -> (i32, i32) {
    %c0_i32 = arith.constant 0 : i32
    %c0_i32_0 = arith.constant 0 : i32
    return %arg0, %c0_i32 : i32, i32
  }
}

</mosaic_0001>

<bundles_post_ra>
// kernel: concept_mixer.1
= control target key start
LH: loop header
LB: loop body
LE: loop exit
PB: predicated region body
PF: predicated region fallthrough
CT: control target
= control target key end

     0   :  { %13 = vsyncpa [#allocation3], 0  ;;  %s1331_s0 = inlined_call_operand.vmem [shape: f32[16,128], index: 0, kind: input, shape index: {}]   ;;  %s1332_s1 = inlined_call_operand.vmem [shape: f32[16,128], index: 1, kind: input, shape index: {}]   ;;  %s1333_s2 = inlined_call_operand.hbm [shape: f32[128,128], index: 2, kind: input, shape index: {}]   ;;  %s1334_s3 = inlined_call_operand.vmem [shape: f32[1,128], index: 3, kind: input, shape index: {}]   ;;  %s1335_s4 = inlined_call_operand.hbm [shape: f32[128,256], index: 4, kind: input, shape index: {}]   ;;  %s1336_s5 = inlined_call_operand.vmem [shape: f32[1,256], index: 5, kind: input, shape index: {}]   ;;  %s1337_s6 = inlined_call_operand.hbm [shape: f32[128,128], index: 6, kind: input, shape index: {}]   ;;  %s1338_s7 = inlined_call_operand.vmem [shape: f32[1,128], index: 7, kind: input, shape index: {}]   ;;  %s1339_s8 = inlined_call_operand.vmem [shape: f32[16,128], index: 8, kind: output, shape index: {}]  }
   0x1   :  { %14 = vsyncpa [#allocation5], 0  ;;  %s1170_s27 = smov 0  }
   0x2 LB: > { %s1115_s28 = smov [#allocation4]   ;;  %s1176_s30 = sadd.s32 4294967295, %s1113_s27   ;;  %s1113_s27 = sphi %s1170_s27, %s20_s27  }
   0x3   : > { %s257_s29 = sshll.u32 %s1115_s28, 4  ;;  %p767_p0 = scmp.ge.s32.totalorder %s1113_s27, 1  ;;  %s1185_s29 = int_to_ptr.vmem [resolvable:$true] %s257_s29 }
   0x4   : > { %p229_p1 = scmp.lt.s32.totalorder %s1113_s27, 3  ;;  %p1340_p2 = scmp.eq.s32.totalorder %s1176_s30, 0 }
   0x5   : > { %s1116_s10 = smov [#allocation2]   ;;  %s1117_s13 = smov [#allocation6]  }
   0x6   : > { %p1181_p3 = pnand %p767_p0, %p229_p1  ;;  %s241_s11 = sshll.u32 %s1116_s10, 4  ;;  %s1189_s11 = int_to_ptr.vmem [resolvable:$true] %s241_s11 }
   0x7   : > { %s1197_s14 = sshll.u32 %s1117_s13, 4  ;;  %s1015_s17 = scalar_lea.hbm %s1335_s4, 4096  ;;  %s274_s14 = int_to_ptr.vmem [resolvable:$true] %s1197_s14 }
   0x8   : > { %s1342_s9 = scalar_select %p1181_p3, 1, 0 }
   0x9   : > { %p979_p4 = pneg %p1181_p3  ;;  %p1016_p6 = scmp.ne.s32.totalorder %s1335_s4, %s1015_s17 }
   0xa   : > { %p1022_p10 = scmp.lt.u32.totalorder %s1015_s17, %s1335_s4 }
   0xb   : > { %p1193_p5 = pnand %p1340_p2, %p979_p4 }
   0xd   : > { %p1207_p7 = pneg %p1193_p5 }
   0xf   : > { %p1018_p8 = pnand %p1207_p7, %p1016_p6 }
  0x11   : > { %p1019_p9 = pneg %p1018_p8 }
  0x13   : > { %p1024_p11 = pnand %p1022_p10, %p1019_p9 }
  0x15   : > { %1027 = shalt.err (!%p1024_p11)
}
  0x16   : > { %s1028_s23 = scalar_lea.vmem %s1185_s29, 4096  ;;  %p1036_p1 = scmp.lt.s32.totalorder %s1185_s29, %s1185_s29 }
  0x17   : > { %p1029_p12 = scmp.ne.s32.totalorder %s1185_s29, %s1028_s23  ;;  %p1037_p4 = scmp.lt.s32.totalorder %s1028_s23, %s1028_s23 }
  0x19   : > { %p1031_p13 = pnand %p1029_p12, %p1207_p7  ;;  %p1038_p6 = por %p1037_p4, %p1036_p1 }
  0x1b   : > { %p1032_p0 = pneg %p1031_p13 }
  0x1d   : > { %p1039_p8 = pnand %p1038_p6, %p1032_p0 }
  0x1f   : > { %1042 = shalt.err (!%p1039_p8)
}
  0x20   : > { %s1118_s24 = smov 256   ;;  %s1119_s25 = smov 16  }
  0x21   : > { %985 = dma.hbm_to_vmem [thread:$0]  (!%p1193_p5), %s1335_s4, 4096, %s1185_s29, [#allocation5], %s1118_s24, %s1118_s24, %s1119_s25  }
  0x22   : > { %s1043_s15 = scalar_lea.hbm %s1333_s2, 2048 }
  0x23   : > { %p1044_p9 = scmp.ne.s32.totalorder %s1333_s2, %s1043_s15  ;;  %p1050_p12 = scmp.lt.u32.totalorder %s1043_s15, %s1333_s2 }
  0x25   : > { %p1046_p10 = pnand %p1044_p9, %p1207_p7 }
  0x27   : > { %p1047_p11 = pneg %p1046_p10 }
  0x29   : > { %p1052_p13 = pnand %p1050_p12, %p1047_p11 }
  0x2b   : > { %1055 = shalt.err (!%p1052_p13)
}
  0x2c   : > { %s1056_s29 = scalar_lea.vmem %s1189_s11, 2048  ;;  %p1064_p6 = scmp.lt.s32.totalorder %s1189_s11, %s1189_s11 }
  0x2d   : > { %p1057_p0 = scmp.ne.s32.totalorder %s1189_s11, %s1056_s29  ;;  %p1065_p8 = scmp.lt.s32.totalorder %s1056_s29, %s1056_s29 }
  0x2f   : > { %p1059_p1 = pnand %p1057_p0, %p1207_p7  ;;  %p1066_p9 = por %p1065_p8, %p1064_p6 }
  0x31   : > { %p1060_p4 = pneg %p1059_p1 }
  0x33   : > { %p1067_p10 = pnand %p1066_p9, %p1060_p4 }
  0x35   : > { %1070 = shalt.err (!%p1067_p10)
}
  0x36   : > { %s1120_s21 = smov 128   ;;  %s1121_s22 = smov 8  }
  0x37   : > { %982 = dma.hbm_to_vmem [thread:$0]  (!%p1193_p5), %s1333_s2, 2048, %s1189_s11, [#allocation3], %s1120_s21, %s1120_s21, %s1121_s22  }
  0x38   : > { %s1071_s28 = scalar_lea.hbm %s1337_s6, 2048 }
  0x39   : > { %p1072_p11 = scmp.ne.s32.totalorder %s1337_s6, %s1071_s28  ;;  %p1078_p0 = scmp.lt.u32.totalorder %s1071_s28, %s1337_s6 }
  0x3b   : > { %p1074_p12 = pnand %p1072_p11, %p1207_p7 }
  0x3d   : > { %p1075_p13 = pneg %p1074_p12 }
  0x3f   : > { %p1080_p1 = pnand %p1078_p0, %p1075_p13 }
  0x41   : > { %1083 = shalt.err (!%p1080_p1)
}
  0x42   : > { %s1084_s17 = scalar_lea.vmem %s274_s14, 2048  ;;  %p1092_p9 = scmp.lt.s32.totalorder %s274_s14, %s274_s14 }
  0x43   : > { %p1085_p4 = scmp.ne.s32.totalorder %s274_s14, %s1084_s17  ;;  %p1093_p10 = scmp.lt.s32.totalorder %s1084_s17, %s1084_s17 }
  0x45   : > { %p1087_p6 = pnand %p1085_p4, %p1207_p7  ;;  %p1094_p2 = por %p1093_p10, %p1092_p9 }
  0x47   : > { %p1088_p8 = pneg %p1087_p6 }
  0x49   : > { %p1095_p3 = pnand %p1094_p2, %p1088_p8 }
  0x4b   : > { %1098 = shalt.err (!%p1095_p3)
}
  0x4c   : > { %988 = dma.hbm_to_vmem [thread:$0]  (!%p1193_p5), %s1337_s6, 2048, %s274_s14, [#allocation5], %s1120_s21, %s1120_s21, %s1121_s22  }
  0x4d   : > { %p1345_p11 = scmp.ne.s32.totalorder %s1342_s9, 0 }
  0x4e   : > { %p1346_p12 = scmp.eq.s32.totalorder (!%p1345_p11), %s1176_s30, 0 }
  0x4f   : > { %306 = sbr.rel (%p1345_p11) target bundleno = 572 (0x23c), region = 52 }
  0x56   : > { %1104 = dma.done.wait (%p1346_p12), [#allocation3], 2048   ;;  %p1347_p7 = pmov %p1346_p12 }
  0x58   : > { %1106 = vsyncadd (%p1347_p7), [#allocation3], 4294965248  ;;  %p1348_p13 = pmov %p1347_p7 }
  0x59   : > { %p1349_p2 = pmov %p1347_p7 }
  0x5a   : > { %1108 = dma.done.wait (%p1348_p13), [#allocation5], 6144  }
  0x5b   : > { %1110 = vsyncadd (%p1349_p2), [#allocation5], 4294961152  ;;  %v1122_v0 = vmov 0.0|0.0   ;;  %v1123_v1 = vmov 0.0   ;;  %vm1124_vm0 = vmmov 0   ;;  %v381_v2 = vld [vmem:[#allocation4 + $0x8] sm:$0xff] }
  0x5c   : > { %887 = vmatprep.subr.bf16.mxu0 %v1122_v0  ;;  %581 = vmatprep.mubr.f32.mxu1 %v1123_v1  ;;  %v383_v3 = vld [vmem:[#allocation4 + $0x18] sm:$0xff]  ;;  %v380_v4 = vld [vmem:[#allocation4] sm:$0xff]  ;;  %v382_v6 = vld [vmem:[#allocation4 + $0x10] sm:$0xff]  ;;  %p350_p3 = scmp.lt.s32.totalorder %s1176_s30, 1 }
  0x5d   : > { %849 = vmatprep.mubr.msk.f32.mxu0 %vm1124_vm0, %v1123_v1  ;;  %v911_v5 = vpack.c.bf16 %v383_v3, %v381_v2  ;;  %v385_v7 = vld [vmem:[#allocation4 + $0x28] sm:$0xff]  ;;  %v387_v8 = vld [vmem:[#allocation4 + $0x38] sm:$0xff]  ;;  %v913_v9 = vpack.c.bf16 %v382_v6, %v380_v4  ;;  %v384_v11 = vld [vmem:[#allocation4 + $0x20] sm:$0xff] }
  0x5e   : > { %v915_v10 = vpack.c.bf16 %v387_v8, %v385_v7  ;;  %v386_v12 = vld [vmem:[#allocation4 + $0x30] sm:$0xff]  ;;  %v389_v13 = vld [vmem:[#allocation4 + $0x48] sm:$0xff]  ;;  %v391_v14 = vld [vmem:[#allocation4 + $0x58] sm:$0xff]  ;;  %s1351_s30 = smov (!%p350_p3, %s1176_s30), 1 }
  0x5f   : > { %912 = vmatprep.subr.bf16.mxu1 %v911_v5  ;;  %v917_v15 = vpack.c.bf16 %v386_v12, %v384_v11  ;;  %v364_v16 = vld [vmem:[#allocation2] sm:$0xff]  ;;  %v365_v17 = vld [vmem:[#allocation2 + $0x8] sm:$0xff]  ;;  %v919_v18 = vpack.c.bf16 %v391_v14, %v389_v13  ;;  %v390_v20 = vld [vmem:[#allocation4 + $0x50] sm:$0xff]  ;;  %s1293_s9 = sshll.u32 %s1351_s30, 3 }
  0x60   : > { %914 = vmatpush1.bf16.msra.mxu1 %v913_v9  ;;  %v388_v19 = vld [vmem:[#allocation4 + $0x40] sm:$0xff]  ;;  %v888_v21 = vpack.c.bf16 %v365_v17, %v364_v16  ;;  %v393_v22 = vld [vmem:[#allocation4 + $0x68] sm:$0xff]  ;;  %v395_v23 = vld [vmem:[#allocation4 + $0x78] sm:$0xff]  ;;  %s353_s20 = scalar_lea.vmem %s1331_s0, %s1293_s9  ;;  %s357_s29 = scalar_lea.vmem %s1332_s1, %s1293_s9 }
  0x61   : > { %916 = vmatprep.subr.bf16.mxu1 %v915_v10  ;;  %v366_v24 = vld [vmem:[#allocation2 + $0x10] sm:$0xff]  ;;  %v367_v25 = vld [vmem:[#allocation2 + $0x18] sm:$0xff]  ;;  %v921_v27 = vpack.c.bf16 %v390_v20, %v388_v19  ;;  %v368_v28 = vld [vmem:[#allocation2 + $0x20] sm:$0xff]  ;;  %v923_v30 = vpack.c.bf16 %v395_v23, %v393_v22  ;;  %s361_s13 = scalar_lea.vmem %s1339_s8, %s1293_s9 }
  0x62   : > { %889 = vmatpush3.bf16.msra.mxu0 %v888_v21  ;;  %v891_v26 = vpack.c.bf16 %v367_v25, %v366_v24  ;;  %v369_v29 = vld [vmem:[#allocation2 + $0x28] sm:$0xff]  ;;  %v392_v31 = vld [vmem:[#allocation4 + $0x60] sm:$0xff]  ;;  %v394_v32 = vld [vmem:[#allocation4 + $0x70] sm:$0xff] }
  0x63   : > { %890 = vmatprep.subr.bf16.mxu0 %v1122_v0  ;;  %v397_v33 = vld [vmem:[#allocation4 + $0x88] sm:$0xff]  ;;  %v399_v34 = vld [vmem:[#allocation4 + $0x98] sm:$0xff]  ;;  %v894_v35 = vpack.c.bf16 %v369_v29, %v368_v28  ;;  %v925_v36 = vpack.c.bf16 %v394_v32, %v392_v31  ;;  %v370_v37 = vld [vmem:[#allocation2 + $0x30] sm:$0xff] }
  0x64   : > { %918 = vmatpush1.bf16.msra.mxu1 %v917_v15  ;;  %v371_v38 = vld [vmem:[#allocation2 + $0x38] sm:$0xff]  ;;  %v927_v39 = vpack.c.bf16 %v399_v34, %v397_v33  ;;  %v396_v40 = vld [vmem:[#allocation4 + $0x80] sm:$0xff]  ;;  %v398_v41 = vld [vmem:[#allocation4 + $0x90] sm:$0xff] }
  0x65   : > { %920 = vmatprep.subr.bf16.mxu1 %v919_v18  ;;  %v401_v42 = vld [vmem:[#allocation4 + $0xa8] sm:$0xff]  ;;  %v403_v43 = vld [vmem:[#allocation4 + $0xb8] sm:$0xff]  ;;  %v897_v44 = vpack.c.bf16 %v371_v38, %v370_v37  ;;  %v929_v45 = vpack.c.bf16 %v398_v41, %v396_v40  ;;  %v372_v46 = vld [vmem:[#allocation2 + $0x40] sm:$0xff]  ;;  %v507_v37 = vlaneseq }
  0x66   : > { %892 = vmatpush3.bf16.msra.mxu0 %v891_v26  ;;  %v373_v47 = vld [vmem:[#allocation2 + $0x48] sm:$0xff]  ;;  %v931_v48 = vpack.c.bf16 %v403_v43, %v401_v42  ;;  %v400_v49 = vld [vmem:[#allocation4 + $0xa0] sm:$0xff]  ;;  %v402_v50 = vld [vmem:[#allocation4 + $0xb0] sm:$0xff] }
  0x67   : > { %893 = vmatprep.subr.bf16.mxu0 %v1122_v0  ;;  %v405_v51 = vld [vmem:[#allocation4 + $0xc8] sm:$0xff]  ;;  %v407_v52 = vld [vmem:[#allocation4 + $0xd8] sm:$0xff]  ;;  %v900_v53 = vpack.c.bf16 %v373_v47, %v372_v46  ;;  %v933_v54 = vpack.c.bf16 %v402_v50, %v400_v49  ;;  %v374_v55 = vld [vmem:[#allocation2 + $0x50] sm:$0xff]  ;;  %v508_v38 = vshrl.u32 %v507_v37, 7 }
  0x68   : > { %922 = vmatpush1.bf16.msra.mxu1 %v921_v27  ;;  %v375_v56 = vld [vmem:[#allocation2 + $0x58] sm:$0xff]  ;;  %v935_v57 = vpack.c.bf16 %v407_v52, %v405_v51  ;;  %v404_v58 = vld [vmem:[#allocation4 + $0xc0] sm:$0xff]  ;;  %v406_v59 = vld [vmem:[#allocation4 + $0xd0] sm:$0xff] }
  0x69   : > { %924 = vmatprep.subr.bf16.mxu1 %v923_v30  ;;  %v409_v60 = vld [vmem:[#allocation4 + $0xe8] sm:$0xff]  ;;  %v411_v61 = vld [vmem:[#allocation4 + $0xf8] sm:$0xff]  ;;  %v903_v62 = vpack.c.bf16 %v375_v56, %v374_v55  ;;  %v937_v63 = vpack.c.bf16 %v406_v59, %v404_v58  ;;  %v376_v2 = vld [vmem:[#allocation2 + $0x60] sm:$0xff] }
  0x6a   : > { %895 = vmatpush3.bf16.msra.mxu0 %v894_v35  ;;  %v377_v3 = vld [vmem:[#allocation2 + $0x68] sm:$0xff]  ;;  %v939_v4 = vpack.c.bf16 %v411_v61, %v409_v60  ;;  %v408_v5 = vld [vmem:[#allocation4 + $0xe0] sm:$0xff]  ;;  %v410_v6 = vld [vmem:[#allocation4 + $0xf0] sm:$0xff] }
  0x6b   : > { %896 = vmatprep.subr.bf16.mxu0 %v1122_v0  ;;  %v906_v7 = vpack.c.bf16 %v377_v3, %v376_v2  ;;  %v941_v8 = vpack.c.bf16 %v410_v6, %v408_v5  ;;  %v378_v9 = vld [vmem:[#allocation2 + $0x70] sm:$0xff]  ;;  %v379_v10 = vld [vmem:[#allocation2 + $0x78] sm:$0xff]  ;;  %v362_v12 = vld [vmem:[%s353_s20] sm:$0xff] }
  0x6c   : > { %926 = vmatpush1.bf16.msra.mxu1 %v925_v36  ;;  %v909_v11 = vpack.c.bf16 %v379_v10, %v378_v9  ;;  %v412_v13 = vld [vmem:[#allocation6] sm:$0xff]  ;;  %v413_v14 = vld [vmem:[#allocation6 + $0x8] sm:$0xff]  ;;  %v414_v17 = vld [vmem:[#allocation6 + $0x10] sm:$0xff] }
  0x6d   : > { %928 = vmatprep.subr.bf16.mxu1 %v927_v39  ;;  %v363_v15 = vld [vmem:[%s357_s29] sm:$0xff]  ;;  %v944_v16 = vpack.c.bf16 %v413_v14, %v412_v13  ;;  %v415_v18 = vld [vmem:[#allocation6 + $0x18] sm:$0xff]  ;;  %v417_v21 = vld [vmem:[#allocation6 + $0x28] sm:$0xff]  ;;  %v513_v39 = vsub.s32 1, %v508_v38 }
  0x6e   : > { %898 = vmatpush3.bf16.msra.mxu0 %v897_v44  ;;  %v947_v19 = vpack.c.bf16 %v415_v18, %v414_v17  ;;  %v416_v20 = vld [vmem:[#allocation6 + $0x20] sm:$0xff]  ;;  %v418_v23 = vld [vmem:[#allocation6 + $0x30] sm:$0xff]  ;;  %v419_v24 = vld [vmem:[#allocation6 + $0x38] sm:$0xff] }
  0x6f   : > { %899 = vmatprep.subr.bf16.mxu0 %v1122_v0  ;;  %v950_v22 = vpack.c.bf16 %v417_v21, %v416_v20  ;;  %v953_v25 = vpack.c.bf16 %v419_v24, %v418_v23  ;;  %v420_v26 = vld [vmem:[#allocation6 + $0x40] sm:$0xff]  ;;  %v421_v27 = vld [vmem:[#allocation6 + $0x48] sm:$0xff]  ;;  %v422_v28 = vld [vmem:[#allocation6 + $0x50] sm:$0xff] }
  0x70   : > { %930 = vmatpush1.bf16.msra.mxu1 %v929_v45  ;;  %v423_v29 = vld [vmem:[#allocation6 + $0x58] sm:$0xff]  ;;  %v424_v31 = vld [vmem:[#allocation6 + $0x60] sm:$0xff]  ;;  %v425_v32 = vld [vmem:[#allocation6 + $0x68] sm:$0xff] }
  0x71   : > { %932 = vmatprep.subr.bf16.mxu1 %v931_v48  ;;  %v959_v30 = vpack.c.bf16 %v423_v29, %v422_v28  ;;  %v962_v33 = vpack.c.bf16 %v425_v32, %v424_v31  ;;  %v426_v34 = vld [vmem:[#allocation6 + $0x70] sm:$0xff]  ;;  %v427_v35 = vld [vmem:[#allocation6 + $0x78] sm:$0xff]  ;;  %v505_v40 = vld [vmem:[%s1336_s5] sm:$0x3] }
  0x72   : > { %901 = vmatpush3.bf16.msra.mxu0 %v900_v53  ;;  %v965_v36 = vpack.c.bf16 %v427_v35, %v426_v34  ;;  %v514_v41 = vrot.slane %v505_v40, %v513_v39  ;;  %v779_v47 = vld [vmem:[%s1334_s3] ss:$0 sm:$0xff] }
  0x73   : > { %902 = vmatprep.subr.bf16.mxu0 %v1122_v0 }
  0x74   : > { %934 = vmatpush1.bf16.msra.mxu1 %v933_v54  ;;  %v780_v54 = vld [vmem:[%s1338_s7] ss:$0 sm:$0xff] }
  0x75   : > { %936 = vmatprep.subr.bf16.mxu1 %v935_v57 }
  0x76   : > { %904 = vmatpush3.bf16.msra.mxu0 %v903_v62 }
  0x77   : > { %905 = vmatprep.subr.bf16.mxu0 %v1122_v0 }
  0x78   : > { %938 = vmatpush1.bf16.msra.mxu1 %v937_v63 }
  0x79   : > { %940 = vmatprep.subr.bf16.mxu1 %v939_v4 }
  0x7a   : > { %907 = vmatpush3.bf16.msra.mxu0 %v906_v7 }
  0x7b   : > { %908 = vmatprep.subr.bf16.mxu0 %v1122_v0 }
  0x7c   : > { %942 = vmatpush1.bf16.msra.mxu1 %v941_v8 }
  0x7e   : > { %910 = vmatpush3.bf16.msra.mxu0 %v909_v11 }
  0x7f   : > { %582 = vmatmul.mubr.f32.vlgmr.msra.gmra.mrb[0].mxu1 %v362_v12  ;;  %943 = vmatprep.subr.bf16.mxu0 %v1122_v0 }
  0x81   : > { %850 = vmatmul.mubr.f32.vlgmr.msra.gmra.mrb[0].mxu0 %v363_v15 }
  0x82   : > { %945 = vmatpush3.bf16.msra.mxu0 %v944_v16  ;;  %884 = vmatprep.mubr.msk.f32.mxu0 %vm1124_vm0, %v1123_v1  ;;  %v956_v1 = vpack.c.bf16 %v421_v27, %v420_v26 }
  0x83   : > { %946 = vmatprep.subr.bf16.mxu0 %v1122_v0 }
  0x86   : > { %948 = vmatpush3.bf16.msra.mxu0 %v947_v19 }
  0x87   : > { %949 = vmatprep.subr.bf16.mxu0 %v1122_v0 }
  0x8a   : > { %951 = vmatpush3.bf16.msra.mxu0 %v950_v22 }
  0x8b   : > { %952 = vmatprep.subr.bf16.mxu0 %v1122_v0 }
  0x8e   : > { %954 = vmatpush3.bf16.msra.mxu0 %v953_v25 }
  0x8f   : > { %955 = vmatprep.subr.bf16.mxu0 %v1122_v0 }
  0x92   : > { %957 = vmatpush3.bf16.msra.mxu0 %v956_v1 }
  0x93   : > { %958 = vmatprep.subr.bf16.mxu0 %v1122_v0 }
  0x96   : > { %960 = vmatpush3.bf16.msra.mxu0 %v959_v30 }
  0x97   : > { %961 = vmatprep.subr.bf16.mxu0 %v1122_v0 }
  0x9a   : > { %963 = vmatpush3.bf16.msra.mxu0 %v962_v33 }
  0x9b   : > { %964 = vmatprep.subr.bf16.mxu0 %v1122_v0  ;;  %v509_v0 = vsub.s32 0, %v508_v38 }
  0x9d   : > { %v510_v48 = vrot.slane %v505_v40, %v509_v0 }
  0x9e   : > { %966 = vmatpush3.bf16.msra.mxu0 %v965_v36 }
 0x152   : > { %v583_v42 = vpop.f32.mrb[0].mxu1 }
 0x153   : > { %v585_v43 = vpop.f32.mrb[1].mxu1  ;;  %v584_v51 = vadd.f32 %v583_v42, %v510_v48 }
 0x154   : > { %v586_v44 = vadd.f32 %v585_v43, %v514_v41  ;;  %v501_v45 = vpop.f32.mrb[0].mxu0 }
 0x155   : > { %v851_v46 = vpop.f32.mrb[1].mxu0  ;;  %v502_v49 = vadd.f32 %v779_v47, %v501_v45 }
 0x156   : > { %1013 = vtanh.f32 %v586_v44 }
 0x160   : > { %v1014_v50 = vpop.eup %1013 }
 0x161   : > { %v589_v52 = vmul.f32 %v1014_v50, %v502_v49 }
 0x163   : > { %v590_v53 = vadd.f32 %v589_v52, %v584_v51 }
 0x165   : > { %885 = vmatmul.mubr.f32.vlgmr.msra.gmra.mrb[2].mxu0 %v590_v53 }
 0x238   : > { %v664_v55 = vpop.f32.mrb[2].mxu0 }
 0x239   : > { %v665_v56 = vadd.f32 %v780_v54, %v664_v55  ;;  %v886_v57 = vpop.f32.mrb[3].mxu0 }
 0x23b   : > { %668 = vst [vmem:[%s361_s13] sm:$0xff] %v665_v56 }
 0x23c PF: > { %s20_s27 = sadd.s32 1, %s1113_s27  }
 0x23d   : > { %p17_p5 = scmp.ge.s32.totalorder %s20_s27, 4  }
 0x23f   :  { %19 = sbr.rel (!%p17_p5) target bundleno = 2 (0x2), region = 98 }
 0x246   :  { %688 = vsyncpa [#allocation3], 1 }
 0x247   :  { %690 = vsyncpa [#allocation3 + $0x1], 1 }
 0x248   :  { %691 = vsyncpa [#allocation5], 1 }

</bundles_post_ra>
